<compile_context>
chip_gen: v7x
topology: tpu7x:2x2x1
jax: 0.10.0
libtpu: 0.0.40
codegen_flags: <defaults>
</compile_context>

<pallas_src>
import functools

import jax
import jax.numpy as jnp
from jax.experimental import pallas as pl
from jax.experimental.pallas import tpu as pltpu

BN_EPS = 1e-5
_BLOCK_BUDGET_BYTES = 2 * 1024 * 1024  # per-block target; ~4 blocks live (2x in + 2x out)


# ------------------------------ tile selection ------------------------------ #

def _pick_tiles(N, C, HW, itemsize):
    """Choose (bn, hw_t): batch block and lane tile for the x blocks.

    hw_t is HW itself if a full (C, HW) slab fits the budget, otherwise the
    largest multiple of 128 that divides HW and fits (keeps loads/stores
    lane-dense and unmasked).  bn batches several batch elements per grid step
    when blocks are tiny, amortizing the ~0.35us per-grid-step overhead.
    """
    if C * HW * itemsize <= _BLOCK_BUDGET_BYTES:
        hw_t = HW
    else:
        max_t = max(128, (_BLOCK_BUDGET_BYTES // (C * itemsize)) // 128 * 128)
        hw_t = HW  # fallback: full rows if HW has no usable 128-multiple divisor
        # TODO(synk): tile C instead when a full-HW row does not fit VMEM and HW
        #             cannot be tiled in 128-lane chunks.
        for cand in range(min(max_t, (HW // 128) * 128), 0, -128):
            if HW % cand == 0:
                hw_t = cand
                break
    bn = 1
    for d in range(1, N + 1):
        if N % d == 0 and d * C * hw_t * itemsize <= _BLOCK_BUDGET_BYTES:
            bn = d
    return bn, hw_t


# ------------------------------ Pallas kernels ------------------------------ #

def _gap_kernel(x_ref, gap_ref, *, inv_hw):
    """Accumulate per-channel sums over HW tiles; finalize to branch means.

    x_ref:   (bn, C, hw_t) tile of x.
    gap_ref: (bn, 2, C) resident accumulator across the (arbitrary) HW grid axis;
             on the last HW step it is finalized to
             [:, 0, :] = mean((x - |x|) * 0.5)   (min branch GAP)
             [:, 1, :] = mean(relu(x))           (max branch GAP)
    """
    h = pl.program_id(1)

    @pl.when(h == 0)
    def _init():
        gap_ref[...] = jnp.zeros_like(gap_ref)

    x = x_ref[...].astype(jnp.float32)                 # (bn, C, hw_t)
    s_all = jnp.sum(x, axis=-1)                        # (bn, C)   sum(x)
    s_pos = jnp.sum(jnp.maximum(x, 0.0), axis=-1)      # (bn, C)   sum(relu(x))
    gap_ref[...] += jnp.stack([s_all, s_pos], axis=1)  # (bn, 2, C)

    @pl.when(h == pl.num_programs(1) - 1)
    def _finalize():
        acc = gap_ref[...]                             # (bn, 2, C)
        s_all_f = acc[:, 0, :]
        s_pos_f = acc[:, 1, :]
        gmin = (s_all_f - s_pos_f) * inv_hw            # mean((x - |x|) * 0.5)
        gmax = s_pos_f * inv_hw                        # mean(relu(x))
        gap_ref[...] = jnp.stack([gmin, gmax], axis=1)


def _apply_kernel(x_ref, sig_ref, o_ref):
    """out = relu(x) + 0.5*sigma*(x-|x|)  ==  where(x >= 0, x, sigma * x)."""
    x = x_ref[...]                                     # (bn, C, hw_t)
    sig = sig_ref[0][:, :, None].astype(x.dtype)       # (bn, C, 1), lane-dense load
    o_ref[...] = jnp.where(x >= 0, x, sig * x)


# --------------------------------- wrapper ---------------------------------- #

@jax.jit
def aprelu_forward(x, w1, b1, g1, be1, w2, b2, g2, be2):
    N, C, H, W = x.shape
    HW = H * W
    x3 = x.reshape(N, C, HW)
    itemsize = jnp.dtype(x.dtype).itemsize

    bn, hw_t = _pick_tiles(N, C, HW, itemsize)
    n_blocks = N // bn
    hw_blocks = HW // hw_t

    block_bytes = bn * C * hw_t * itemsize
    # 2x in + 2x out double-buffers + small resident operands + slack; clamp so it
    # stays within v7x's 64 MiB physical VMEM and above v5e's 16 MiB scoped default.
    vmem_limit = int(min(48 << 20, max(16 << 20, 4 * block_bytes + (4 << 20))))

    # ---- 1) GAP of min/max branches (memory-bound Pallas pass over x). --------
    gap = pl.pallas_call(
        functools.partial(_gap_kernel, inv_hw=1.0 / HW),
        out_shape=jax.ShapeDtypeStruct((N, 2, C), jnp.float32),
        grid=(n_blocks, hw_blocks),
        in_specs=[pl.BlockSpec((bn, C, hw_t), lambda n, h: (n, 0, h))],
        out_specs=pl.BlockSpec((bn, 2, C), lambda n, h: (n, 0, 0)),
        compiler_params=pltpu.CompilerParams(
            dimension_semantics=("parallel", "arbitrary"),
            vmem_limit_bytes=vmem_limit),
    )(x3)

    # ---- 2) Squeeze / excitation (tiny; plain JAX, training-mode batch-stats BN).
    # (N, 2, C) -> (N, 2C): first C columns = min GAP, next C = max GAP
    # (matches torch.cat((x_min_gap, x_max_gap), dim=1).view(N, 2C)).
    g = gap.reshape(N, 2 * C)
    s = jnp.dot(g, w1, preferred_element_type=jnp.float32) + b1
    m = jnp.mean(s, axis=0, keepdims=True)
    v = jnp.mean((s - m) ** 2, axis=0, keepdims=True)
    s = jnp.maximum((s - m) * jax.lax.rsqrt(v + BN_EPS) * g1 + be1, 0.0)
    e = jnp.dot(s, w2, preferred_element_type=jnp.float32) + b2
    m = jnp.mean(e, axis=0, keepdims=True)
    v = jnp.mean((e - m) ** 2, axis=0, keepdims=True)
    e = (e - m) * jax.lax.rsqrt(v + BN_EPS) * g2 + be2
    sigma = jax.nn.sigmoid(e)                          # (N, C) f32

    # ---- 3) Elementwise combine (second memory-bound Pallas pass over x). -----
    sigma_blocks = sigma.reshape(n_blocks, bn, C)      # lane-dense per-block sigma
    out = pl.pallas_call(
        _apply_kernel,
        out_shape=jax.ShapeDtypeStruct((N, C, HW), x.dtype),
        grid=(n_blocks, hw_blocks),
        in_specs=[pl.BlockSpec((bn, C, hw_t), lambda n, h: (n, 0, h)),
                  pl.BlockSpec((1, bn, C), lambda n, h: (n, 0, 0))],
        out_specs=pl.BlockSpec((bn, C, hw_t), lambda n, h: (n, 0, h)),
        compiler_params=pltpu.CompilerParams(
            dimension_semantics=("parallel", "parallel"),
            vmem_limit_bytes=vmem_limit),
        # TODO(synk): add input_output_aliases={0: 0} if callers never reuse x,
        #             to halve the HBM footprint of this op.
    )(x3, sigma_blocks)

    return out.reshape(N, C, H, W)


# ---------------------------- pure-JAX reference ----------------------------- #

def _reference(x, w1, b1, w2, b2):
    x_min = (x - jnp.abs(x)) * 0.5
    x_max = jnp.maximum(x, 0.0)
    gmin = x_min.mean(axis=(2, 3))
    gmax = x_max.mean(axis=(2, 3))
    xc = jnp.concatenate([gmin, gmax], axis=1)
    s = xc @ w1 + b1
    m = s.mean(0, keepdims=True); v = ((s - m) ** 2).mean(0, keepdims=True)
    s = jnp.maximum((s - m) / jnp.sqrt(v + BN_EPS), 0.0)
    e = s @ w2 + b2
    m = e.mean(0, keepdims=True); v = ((e - m) ** 2).mean(0, keepdims=True)
    e = (e - m) / jnp.sqrt(v + BN_EPS)
    sig = jax.nn.sigmoid(e)
    return jnp.maximum(x, 0.0) + 0.5 * sig[:, :, None, None] * (x - jnp.abs(x))


if __name__ == "__main__":
    key = jax.random.PRNGKey(0)
    kx, kw1, kb1, kw2, kb2 = jax.random.split(key, 5)

    N, C, H, W = 2, 4, 16, 16
    x = jax.random.normal(kx, (N, C, H, W), dtype=jnp.float32)

    # fc_squeeze: weight (C, 2C), kaiming_normal(fan_in=2C, gain=sqrt(2));
    # bias keeps nn.Linear default U(-1/sqrt(fan_in), 1/sqrt(fan_in)).
    fan_in1 = 2 * C
    w1_t = jax.random.normal(kw1, (C, 2 * C), jnp.float32) * jnp.sqrt(2.0 / fan_in1)
    b1 = jax.random.uniform(kb1, (C,), jnp.float32,
                            -1.0 / jnp.sqrt(float(fan_in1)), 1.0 / jnp.sqrt(float(fan_in1)))
    # fc_excitation: weight (C, C), kaiming_normal(fan_in=C).
    fan_in2 = C
    w2_t = jax.random.normal(kw2, (C, C), jnp.float32) * jnp.sqrt(2.0 / fan_in2)
    b2 = jax.random.uniform(kb2, (C,), jnp.float32,
                            -1.0 / jnp.sqrt(float(fan_in2)), 1.0 / jnp.sqrt(float(fan_in2)))

    w1 = w1_t.T                    # (2C, C) so that y = x @ w1 + b1 == x @ W^T + b
    w2 = w2_t.T                    # (C, C)
    b1r = b1.reshape(1, C)
    b2r = b2.reshape(1, C)
    g1 = jnp.ones((1, C), jnp.float32); be1 = jnp.zeros((1, C), jnp.float32)
    g2 = jnp.ones((1, C), jnp.float32); be2 = jnp.zeros((1, C), jnp.float32)

    out = aprelu_forward(x, w1, b1r, g1, be1, w2, b2r, g2, be2)
    out = jax.block_until_ready(out)

    ref = _reference(x, w1, b1r, w2, b2r)
    assert out.shape == (N, C, H, W)
    err = float(jnp.max(jnp.abs(out - ref)))
    assert jnp.allclose(out, ref, atol=2e-4, rtol=2e-4), err

    print("KERNEL_OK")
</pallas_src>

<mosaic_0001>
module attributes {stable_mosaic.version = 11 : i64} {
  func.func @_gap_kernel(%arg0: i32, %arg1: i32, %arg2: memref<2x4x256xf32, #tpu.memory_space<vmem>>, %arg3: memref<2x2x4xf32, #tpu.memory_space<vmem>>) attributes {dimension_semantics = [#tpu.dimension_semantics<parallel>, #tpu.dimension_semantics<arbitrary>], iteration_bounds = array<i64: 1, 1>, scalar_prefetch = 0 : i64, scratch_operands = 0 : i64, tpu.core_type = #tpu.core_type<tc>, window_params = [{transform_indices = @transform_0, window_bounds = array<i64: 2, 4, 256>}, {transform_indices = @transform_1, window_bounds = array<i64: 2, 2, 4>}]} {
    %c0_i32 = arith.constant 0 : i32
    %0 = arith.cmpi eq, %arg1, %c0_i32 : i32
    %1 = arith.extui %0 : i1 to i32
    %c0_i32_0 = arith.constant 0 : i32
    %2 = arith.cmpi ne, %1, %c0_i32_0 : i32
    scf.if %2 {
      %cst_13 = arith.constant 0.000000e+00 : f32
      %17 = vector.broadcast %cst_13 : f32 to vector<2x2x4xf32>
      %c0_14 = arith.constant 0 : index
      %c0_15 = arith.constant 0 : index
      %c0_16 = arith.constant 0 : index
      %18 = vector.load %arg3[%c0_14, %c0_15, %c0_16] : memref<2x2x4xf32, #tpu.memory_space<vmem>>, vector<2x2x4xf32>
      tpu.vector_store %arg3[%c0_14, %c0_15, %c0_16], %17 {strides = array<i32>} : memref<2x2x4xf32, #tpu.memory_space<vmem>>, vector<2x2x4xf32>,
    } else {
    }
    %c0 = arith.constant 0 : index
    %c0_1 = arith.constant 0 : index
    %c0_2 = arith.constant 0 : index
    %3 = vector.load %arg2[%c0, %c0_1, %c0_2] : memref<2x4x256xf32, #tpu.memory_space<vmem>>, vector<2x4x256xf32>
    %cst = arith.constant dense<0.000000e+00> : vector<2x4xf32>
    %4 = vector.multi_reduction <add>, %3, %cst [2] : vector<2x4x256xf32> to vector<2x4xf32>
    %cst_3 = arith.constant 0.000000e+00 : f32
    %5 = vector.broadcast %cst_3 : f32 to vector<2x4x256xf32>
    %6 = arith.maximumf %3, %5 : vector<2x4x256xf32>
    %cst_4 = arith.constant dense<0.000000e+00> : vector<2x4xf32>
    %7 = vector.multi_reduction <add>, %6, %cst_4 [2] : vector<2x4x256xf32> to vector<2x4xf32>
    %c0_5 = arith.constant 0 : index
    %c0_6 = arith.constant 0 : index
    %c0_7 = arith.constant 0 : index
    %8 = vector.load %arg3[%c0_5, %c0_6, %c0_7] : memref<2x2x4xf32, #tpu.memory_space<vmem>>, vector<2x2x4xf32>
    %9 = vector.shape_cast %4 : vector<2x4xf32> to vector<2x1x4xf32>
    %10 = vector.shape_cast %7 : vector<2x4xf32> to vector<2x1x4xf32>
    %11 = tpu.concatenate %9, %10 in 1 : vector<2x1x4xf32>, vector<2x1x4xf32> -> vector<2x2x4xf32>
    %12 = arith.addf %8, %11 : vector<2x2x4xf32>
    %c0_8 = arith.constant 0 : index
    %c0_9 = arith.constant 0 : index
    %c0_10 = arith.constant 0 : index
    %13 = vector.load %arg3[%c0_8, %c0_9, %c0_10] : memref<2x2x4xf32, #tpu.memory_space<vmem>>, vector<2x2x4xf32>
    tpu.vector_store %arg3[%c0_8, %c0_9, %c0_10], %12 {strides = array<i32>} : memref<2x2x4xf32, #tpu.memory_space<vmem>>, vector<2x2x4xf32>,
    %c0_i32_11 = arith.constant 0 : i32
    %14 = arith.cmpi eq, %arg1, %c0_i32_11 : i32
    %15 = arith.extui %14 : i1 to i32
    %c0_i32_12 = arith.constant 0 : i32
    %16 = arith.cmpi ne, %15, %c0_i32_12 : i32
    scf.if %16 {
      %c0_13 = arith.constant 0 : index
      %c0_14 = arith.constant 0 : index
      %c0_15 = arith.constant 0 : index
      %17 = vector.load %arg3[%c0_13, %c0_14, %c0_15] : memref<2x2x4xf32, #tpu.memory_space<vmem>>, vector<2x2x4xf32>
      %18 = vector.extract_strided_slice %17 {offsets = [0, 0, 0], sizes = [2, 1, 4], strides = [1, 1, 1]} : vector<2x2x4xf32> to vector<2x1x4xf32>
      %19 = vector.shape_cast %18 : vector<2x1x4xf32> to vector<2x4xf32>
      %20 = vector.extract_strided_slice %17 {offsets = [0, 1, 0], sizes = [2, 1, 4], strides = [1, 1, 1]} : vector<2x2x4xf32> to vector<2x1x4xf32>
      %21 = vector.shape_cast %20 : vector<2x1x4xf32> to vector<2x4xf32>
      %22 = arith.subf %19, %21 : vector<2x4xf32>
      %cst_16 = arith.constant 3.906250e-03 : f32
      %23 = vector.broadcast %cst_16 : f32 to vector<2x4xf32>
      %24 = arith.mulf %22, %23 : vector<2x4xf32>
      %cst_17 = arith.constant 3.906250e-03 : f32
      %25 = vector.broadcast %cst_17 : f32 to vector<2x4xf32>
      %26 = arith.mulf %21, %25 : vector<2x4xf32>
      %27 = vector.shape_cast %24 : vector<2x4xf32> to vector<2x1x4xf32>
      %28 = vector.shape_cast %26 : vector<2x4xf32> to vector<2x1x4xf32>
      %29 = tpu.concatenate %27, %28 in 1 : vector<2x1x4xf32>, vector<2x1x4xf32> -> vector<2x2x4xf32>
      %c0_18 = arith.constant 0 : index
      %c0_19 = arith.constant 0 : index
      %c0_20 = arith.constant 0 : index
      %30 = vector.load %arg3[%c0_18, %c0_19, %c0_20] : memref<2x2x4xf32, #tpu.memory_space<vmem>>, vector<2x2x4xf32>
      tpu.vector_store %arg3[%c0_18, %c0_19, %c0_20], %29 {strides = array<i32>} : memref<2x2x4xf32, #tpu.memory_space<vmem>>, vector<2x2x4xf32>,
    } else {
    }
    return
  }
  func.func @transform_0(%arg0: i32, %arg1: i32) -> (i32, i32, i32) {
    %c0_i32 = arith.constant 0 : i32
    %c0_i32_0 = arith.constant 0 : i32
    return %arg0, %c0_i32, %arg1 : i32, i32, i32
  }
  func.func @transform_1(%arg0: i32, %arg1: i32) -> (i32, i32, i32) {
    %c0_i32 = arith.constant 0 : i32
    %c0_i32_0 = arith.constant 0 : i32
    %c0_i32_1 = arith.constant 0 : i32
    return %arg0, %c0_i32, %c0_i32_0 : i32, i32, i32
  }
}

module attributes {stable_mosaic.version = 11 : i64} {
  func.func @_apply_kernel(%arg0: i32, %arg1: i32, %arg2: memref<2x4x256xf32, #tpu.memory_space<vmem>>, %arg3: memref<1x2x4xf32, #tpu.memory_space<vmem>>, %arg4: memref<2x4x256xf32, #tpu.memory_space<vmem>>) attributes {dimension_semantics = [#tpu.dimension_semantics<parallel>, #tpu.dimension_semantics<parallel>], iteration_bounds = array<i64: 1, 1>, scalar_prefetch = 0 : i64, scratch_operands = 0 : i64, tpu.core_type = #tpu.core_type<tc>, window_params = [{transform_indices = @transform_0, window_bounds = array<i64: 2, 4, 256>}, {transform_indices = @transform_1, window_bounds = array<i64: 1, 2, 4>}, {transform_indices = @transform_2, window_bounds = array<i64: 2, 4, 256>}]} {
    %c0 = arith.constant 0 : index
    %c0_0 = arith.constant 0 : index
    %c0_1 = arith.constant 0 : index
    %0 = vector.load %arg2[%c0, %c0_0, %c0_1] : memref<2x4x256xf32, #tpu.memory_space<vmem>>, vector<2x4x256xf32>
    %c0_2 = arith.constant 0 : index
    %c0_3 = arith.constant 0 : index
    %c0_4 = arith.constant 0 : index
    %1 = vector.load %arg3[%c0_2, %c0_3, %c0_4] : memref<1x2x4xf32, #tpu.memory_space<vmem>>, vector<1x2x4xf32>
    %2 = vector.shape_cast %1 : vector<1x2x4xf32> to vector<2x4xf32>
    %3 = vector.shape_cast %2 : vector<2x4xf32> to vector<2x4x1xf32>
    %cst = arith.constant 0.000000e+00 : f32
    %4 = vector.broadcast %cst : f32 to vector<2x4x256xf32>
    %5 = arith.cmpf oge, %0, %4 : vector<2x4x256xf32>
    %6 = vector.broadcast %3 : vector<2x4x1xf32> to vector<2x4x256xf32>
    %7 = arith.mulf %6, %0 : vector<2x4x256xf32>
    %8 = arith.select %5, %0, %7 : vector<2x4x256xi1>, vector<2x4x256xf32>
    %c0_5 = arith.constant 0 : index
    %c0_6 = arith.constant 0 : index
    %c0_7 = arith.constant 0 : index
    %9 = vector.load %arg4[%c0_5, %c0_6, %c0_7] : memref<2x4x256xf32, #tpu.memory_space<vmem>>, vector<2x4x256xf32>
    tpu.vector_store %arg4[%c0_5, %c0_6, %c0_7], %8 {strides = array<i32>} : memref<2x4x256xf32, #tpu.memory_space<vmem>>, vector<2x4x256xf32>,
    return
  }
  func.func @transform_0(%arg0: i32, %arg1: i32) -> (i32, i32, i32) {
    %c0_i32 = arith.constant 0 : i32
    %c0_i32_0 = arith.constant 0 : i32
    return %arg0, %c0_i32, %arg1 : i32, i32, i32
  }
  func.func @transform_1(%arg0: i32, %arg1: i32) -> (i32, i32, i32) {
    %c0_i32 = arith.constant 0 : i32
    %c0_i32_0 = arith.constant 0 : i32
    %c0_i32_1 = arith.constant 0 : i32
    return %arg0, %c0_i32, %c0_i32_0 : i32, i32, i32
  }
  func.func @transform_2(%arg0: i32, %arg1: i32) -> (i32, i32, i32) {
    %c0_i32 = arith.constant 0 : i32
    %c0_i32_0 = arith.constant 0 : i32
    return %arg0, %c0_i32, %arg1 : i32, i32, i32
  }
}

</mosaic_0001>

<bundles_post_ra>
// kernel: aprelu_forward.3
= control target key start
LH: loop header
LB: loop body
LE: loop exit
PB: predicated region body
PF: predicated region fallthrough
CT: control target
= control target key end

     0   :  { %v14_v0 = vlaneseq  ;;  %s88_s1 = inlined_call_operand.vmem [shape: f32[1,2,4], index: 1, kind: input, shape index: {}]   ;;  %s89_s0 = inlined_call_operand.vmem [shape: f32[2,4,256], index: 0, kind: input, shape index: {}]   ;;  %s90_s2 = inlined_call_operand.vmem [shape: f32[2,4,256], index: 2, kind: output, shape index: {}]  }
   0x1   :  { %v13_v2 = vld [vmem:[%s88_s1] sm:$0x3]  ;;  %v12_v9 = vld [vmem:[%s89_s0 + $0x8] sm:$0xff] }
   0x2   :  { %v15_v1 = vshrl.u32 %v14_v0, 7  ;;  %v11_v7 = vld [vmem:[%s89_s0] sm:$0xff]  ;;  %v33_v13 = vcombine.high %v12_v9, %v12_v9  ;;  %vm29_vm1 = vcmp.ge.f32.partialorder %v12_v9, 0.0 }
   0x3   :  { %v32_v8 = vcombine.high %v11_v7, %v11_v7  ;;  %vm28_vm0 = vcmp.ge.f32.partialorder %v11_v7, 0.0 }
   0x4   :  { %v16_v3 = vsub.s32 0, %v15_v1  ;;  %v23_v4 = vsub.s32 1, %v15_v1 }
   0x6   :  { %v17_v5 = vrot.slane %v13_v2, %v16_v3  ;;  %v24_v6 = vrot.slane %v13_v2, %v23_v4 }
   0x8   :  { %19 = vbcast.lane.b32.xlu0 %v17_v5, 256 }
   0xc   :  { %26 = vbcast.lane.b32.xlu0 %v24_v6, 256 }
  0x7a   :  { %v20_v10 = vpop.permute.xlu0 %19 }
  0x7b   :  { %v36_v11 = vmul.f32 %v20_v10, %v11_v7  ;;  %v37_v12 = vmul.f32 %v32_v8, %v20_v10 }
  0x7d   :  { %v44_v14 = vcombine.low %v36_v11, %v37_v12 }
  0x7e   :  { %v27_v15 = vpop.permute.xlu0 %26 }
  0x7f   :  { %v48_v16 = vsel %vm28_vm0, %v11_v7, %v44_v14  ;;  %v38_v17 = vmul.f32 %v27_v15, %v12_v9  ;;  %v39_v18 = vmul.f32 %v33_v13, %v27_v15 }
  0x80   :  { %50 = vst [vmem:[%s90_s2] sm:$0xff] %v48_v16 }
  0x81   :  { %v45_v19 = vcombine.low %v38_v17, %v39_v18 }
  0x83   :  { %v49_v20 = vsel %vm29_vm1, %v12_v9, %v45_v19 }
  0x84   :  { %51 = vst [vmem:[%s90_s2 + $0x8] sm:$0xff] %v49_v20 }

// kernel: aprelu_forward.2
= control target key start
LH: loop header
LB: loop body
LE: loop exit
PB: predicated region body
PF: predicated region fallthrough
CT: control target
= control target key end

     0   :  { %vm23_vm0 = vcmask 1043456   ;;  %vm12_vm1 = vcmask 25600   ;;  %v116_v20 = vmov 0.0   ;;  %v56_v21 = vlaneseq  ;;  %s181_s0 = inlined_call_operand.vmem [shape: f32[2,4,256], index: 0, kind: input, shape index: {}]   ;;  %s182_s1 = inlined_call_operand.vmem [shape: f32[2,2,4], index: 1, kind: output, shape index: {}]  }
   0x1   :  { %v15_v0 = vld [vmem:[%s181_s0] sm:$0xff]  ;;  %v16_v1 = vld [vmem:[%s181_s0 + $0x8] sm:$0xff]  ;;  %13 = vst.msk [vmem:[%s182_s1] sm:$0x3] %vm12_vm1, %v116_v20  ;;  %14 = vst.msk [vmem:[%s182_s1 + $0x2] sm:$0x3] %vm12_vm1, %v116_v20 }
   0x2   :  { %v34_v2 = vmax.f32 %v15_v0, 0.0  ;;  %v19_v3 = vcombine.high %v15_v0, %v15_v0  ;;  %v24_v4 = vsel %vm23_vm0, %v15_v0, 0.0  ;;  %v35_v5 = vmax.f32 %v16_v1, 0.0 }
   0x3   :  { %v20_v6 = vcombine.high %v16_v1, %v16_v1  ;;  %v29_v7 = vsel %vm23_vm0, %v16_v1, 0.0  ;;  %v57_v22 = vand.u32 127, %v56_v21  ;;  %v59_v23 = vshrl.u32 %v56_v21, 7 }
   0x4   :  { %v38_v8 = vcombine.high %v34_v2, %v34_v2  ;;  %v42_v9 = vsel %vm23_vm0, %v34_v2, 0.0  ;;  %v25_v10 = vsel %vm23_vm0, %v19_v3, 0.0  ;;  %v39_v11 = vcombine.high %v35_v5, %v35_v5 }
   0x5   :  { %v26_v12 = vadd.f32 %v25_v10, %v24_v4  ;;  %v30_v13 = vsel %vm23_vm0, %v20_v6, 0.0  ;;  %v47_v15 = vsel %vm23_vm0, %v35_v5, 0.0  ;;  %v60_v24 = vsub.s32 %v57_v22, %v59_v23 }
   0x6   :  { %v43_v14 = vsel %vm23_vm0, %v38_v8, 0.0  ;;  %v48_v16 = vsel %vm23_vm0, %v39_v11, 0.0  ;;  %v31_v18 = vadd.f32 %v30_v13, %v29_v7  ;;  %vm80_vm2 = vcmask 1040384  }
   0x7   :  { %v44_v17 = vadd.f32 %v43_v14, %v42_v9  ;;  %27 = vadd.xlane.f32.xlu0 %v26_v12  ;;  %v49_v19 = vadd.f32 %v48_v16, %v47_v15 }
   0x8   :  { %v52_v29 = vld [vmem:[%s182_s1] sm:$0x3]  ;;  %v53_v36 = vld [vmem:[%s182_s1 + $0x2] sm:$0x3] }
   0x9   :  { %45 = vadd.xlane.f32.xlu1 %v44_v17 }
   0xb   :  { %32 = vadd.xlane.f32.xlu0 %v31_v18 }
   0xd   :  { %50 = vadd.xlane.f32.xlu1 %v49_v19 }
  0x94   :  { %v28_v25 = vpop.xlane.xlu0 %27 }
  0x95   :  { %v61_v26 = vrot.slane %v28_v25, %v60_v24 }
  0x96   :  { %v46_v27 = vpop.xlane.xlu1 %45 }
  0x97   :  { %v73_v28 = vrot.slane %v46_v27, %v60_v24 }
  0x98   :  { %v33_v30 = vpop.xlane.xlu0 %32 }
  0x99   :  { %v81_v31 = vsel %vm80_vm2, %v61_v26, %v73_v28  ;;  %v65_v32 = vrot.slane %v33_v30, %v60_v24 }
  0x9a   :  { %v83_v33 = vadd.f32 %v81_v31, %v52_v29  ;;  %v51_v34 = vpop.xlane.xlu1 %50 }
  0x9b   :  { %v77_v35 = vrot.slane %v51_v34, %v60_v24 }
  0x9c   :  { %86 = vst.msk [vmem:[%s182_s1] sm:$0x3] %vm12_vm1, %v83_v33 }
  0x9d   :  { %v82_v37 = vsel %vm80_vm2, %v65_v32, %v77_v35 }
  0x9e   :  { %v84_v38 = vadd.f32 %v82_v37, %v53_v36 }
  0xa0   :  { %87 = vst.msk [vmem:[%s182_s1 + $0x2] sm:$0x3] %vm12_vm1, %v84_v38 }
  0xa3   :  { %v91_v39 = vld [vmem:[%s182_s1] sm:$0x3] }
  0xa4   :  { %v95_v40 = vrot.slane %v91_v39, 1  ;;  %v103_v44 = vmul.f32 0.00390625, %v91_v39 }
  0xa6   :  { %v99_v41 = vsub.f32 %v91_v39, %v95_v40 }
  0xa7   :  { %v92_v42 = vld [vmem:[%s182_s1 + $0x2] sm:$0x3] }
  0xa8   :  { %v101_v43 = vmul.f32 0.00390625, %v99_v41  ;;  %v96_v45 = vrot.slane %v92_v42, 1  ;;  %v104_v49 = vmul.f32 0.00390625, %v92_v42 }
  0xaa   :  { %v105_v46 = vsel %vm80_vm2, %v101_v43, %v103_v44  ;;  %v100_v47 = vsub.f32 %v92_v42, %v96_v45 }
  0xab   :  { %107 = vst.msk [vmem:[%s182_s1] sm:$0x3] %vm12_vm1, %v105_v46 }
  0xac   :  { %v102_v48 = vmul.f32 0.00390625, %v100_v47 }
  0xae   :  { %v106_v50 = vsel %vm80_vm2, %v102_v48, %v104_v49 }
  0xaf   :  { %108 = vst.msk [vmem:[%s182_s1 + $0x2] sm:$0x3] %vm12_vm1, %v106_v50 }

</bundles_post_ra>
